<compile_context>
chip_gen: v7x
topology: tpu7x:2x2x1
jax: 0.10.0
libtpu: 0.0.40
codegen_flags: <defaults>
</compile_context>

<pallas_src>
import functools

import jax
import jax.numpy as jnp
from jax.experimental import pallas as pl
from jax.experimental.pallas import tpu as pltpu

_VMEM_LIMIT = 32 * 1024 * 1024   # generous vs v5e's 16 MiB scoped default, safe on v7x


def _round_up(x, m):
    return ((x + m - 1) // m) * m


# ----------------------------- Kernel A: scoring MLPs -----------------------------
def _scoring_kernel(xT_ref, w1T_ref, b1_ref, w2T_ref, b2_ref, out_ref):
    """Fused per-head scoring MLP, node-on-lane layout.

    xT:  (D, T)       node-feature tile (features on sublane, nodes on lane)
    w1T: (H*K, D)     packed first-layer weights        b1: (H*K, 1)
    w2T: (H+1, H*K)   block-diagonal second layer + one all-zero row
    b2:  (H+1, 1)     per-head biases, last entry = 1.0 (produces the ones row)
    out: (H+1, T)     rows 0..H-1 = per-head scores, row H = ones (augmented for SA)
    """
    hid = jnp.dot(w1T_ref[...], xT_ref[...],
                  preferred_element_type=jnp.float32) + b1_ref[...]
    hid = jnp.maximum(hid, 0.0)                                          # ReLU
    out_ref[...] = jnp.dot(w2T_ref[...], hid,
                           preferred_element_type=jnp.float32) + b2_ref[...]


# ------------------------ Kernel B: one SA layer per call -------------------------
def _sa_accumulate(etT_ref, haug_ref, acc_ref, *, rel_num):
    """Accumulate per-relation sufficient statistics for one (dst-tile, src-tile) step.

    etT:  (Tsrc, Tdst) int8   edge types, sentinel rel_num == "no edge"
    haug: (Hin+1, Tsrc) f32   source-node scores, last row all-ones
    acc:  (R, Hin+1, Tdst)    running [sum_src h ; edge count] per relation
    """
    @pl.when(pl.program_id(1) == 0)
    def _():
        acc_ref[...] = jnp.zeros_like(acc_ref)

    et = etT_ref[...].astype(jnp.int32)                                  # (Tsrc, Tdst)
    haug = haug_ref[...]                                                 # (Hin+1, Tsrc)
    for r in range(rel_num):                                             # static unroll
        sel = (et == r).astype(jnp.float32)                              # (Tsrc, Tdst)
        # MXU: (Hin+1, Tsrc) @ (Tsrc, Tdst) -> per-relation [score sums ; count]
        acc_ref[r] = acc_ref[r] + jnp.dot(haug, sel,
                                          preferred_element_type=jnp.float32)


def _sa_finalize(table_ref, acc_ref, *, hin):
    """Reconstruct the edge softmax + aggregation from per-relation statistics.

    table: (R, H)   per-relation per-head logits (leaky_relu already applied)
    acc:   (R, Hin+1, Tdst) accumulated statistics
    returns (H, Tdst) aggregated per-head scores (ReLU applied)
    """
    acc = acc_ref[...]                                                   # (R, Hin+1, T)
    s = acc[:, :hin, :]                                                  # (R, Hin, T)
    cnt = acc[:, hin:hin + 1, :]                                         # (R, 1, T)
    tab = table_ref[...]                                                 # (R, H)

    neg = jnp.float32(-1e30)
    present = cnt > 0.5                                                  # (R, 1, T)
    masked = jnp.where(present, tab[:, :, None], neg)                    # (R, H, T)
    m = jnp.max(masked, axis=0)                                          # (H, T)
    w = jnp.exp(masked - m[None, :, :])                                  # (R, H, T)
    denom = jnp.sum(w * cnt, axis=0)                                     # (H, T)
    num = jnp.sum(w * s, axis=0)                                         # (H, T) (bcast if hin==1)
    agg = num / jnp.maximum(denom, jnp.float32(1e-30))                   # zero in-degree guard
    # TODO(synk): activation/residual choice follows the GENI paper (SALayer source
    #             was not provided): ReLU, no residual.
    return jnp.maximum(agg, 0.0)


def _sa_mid_kernel(table_ref, etT_ref, haug_ref, out_ref, acc_ref, *, rel_num, hin):
    """Non-final SA layer fused with the inter-layer mean-over-heads (rank-1 state)."""
    _sa_accumulate(etT_ref, haug_ref, acc_ref, rel_num=rel_num)

    @pl.when(pl.program_id(1) == pl.num_programs(1) - 1)
    def _():
        h_new = _sa_finalize(table_ref, acc_ref, hin=hin)                # (H, Tdst)
        mean_row = jnp.mean(h_new, axis=0, keepdims=True)                # (1, Tdst)
        # Row 0 = mean score, row 1 = ones (head-repeat folded into next layer).
        row_id = jax.lax.broadcasted_iota(jnp.int32, (2, mean_row.shape[-1]), 0)
        out_ref[...] = jnp.where(row_id == 0, mean_row, 1.0)


def _sa_last_kernel(table_ref, etT_ref, haug_ref, cent_ref, gamma_ref, beta_ref,
                    out_ref, acc_ref, *, rel_num, hin):
    """Final SA layer fused with the centrality scale + mean + leaky_relu head."""
    _sa_accumulate(etT_ref, haug_ref, acc_ref, rel_num=rel_num)

    @pl.when(pl.program_id(1) == pl.num_programs(1) - 1)
    def _():
        h_new = _sa_finalize(table_ref, acc_ref, hin=hin)                # (H, Tdst)
        scaled = (cent_ref[...] * gamma_ref[...] + beta_ref[...]) * h_new
        mo = jnp.mean(scaled, axis=0, keepdims=True)                     # (1, Tdst)
        out_ref[...] = jnp.where(mo >= 0, mo, 0.01 * mo)  # F.leaky_relu default slope


# --------------------------------- wrapper ---------------------------------------
def geni_forward(params, inputs, adj_mask, edge_type_dense, centrality,
                 *, num_layers, heads, negative_slope,
                 tile_dst=256, tile_src=512, tile_score=512):
    N, D = inputs.shape
    H = heads[0]
    assert len(set(heads[:num_layers])) == 1, "this implementation assumes uniform heads"
    assert heads[-2] == H, "gamma/beta width must match the head count"
    K = params["w1"].shape[-1]
    R = params["rel_emb"].shape[0]
    assert R < 127, "relation sentinel must fit in int8"

    # Pad N up to a multiple of every tile; padded nodes carry the no-edge sentinel.
    pad_base = max(tile_dst, tile_src, tile_score)
    for t in (tile_dst, tile_src, tile_score):
        assert t % 128 == 0 and pad_base % t == 0
    Np = _round_up(N, pad_base)

    high = jax.lax.Precision.HIGHEST
    cparams_1d = pltpu.CompilerParams(
        dimension_semantics=("parallel",), vmem_limit_bytes=_VMEM_LIMIT)
    cparams_2d = pltpu.CompilerParams(
        dimension_semantics=("parallel", "arbitrary"), vmem_limit_bytes=_VMEM_LIMIT)

    # ---- Kernel A: fused scoring MLPs (Dropout is identity in eval mode). ----
    xT = jnp.zeros((D, Np), jnp.float32).at[:, :N].set(inputs.T)          # (D, Np)
    w1T = jnp.transpose(params["w1"], (0, 2, 1)).reshape(H * K, D)        # (H*K, D)
    b1c = params["b1"].reshape(H * K, 1)
    w2_blk = (jnp.eye(H, dtype=jnp.float32)[:, :, None]
              * params["w2"][None, :, :]).reshape(H, H * K)               # block-diagonal
    w2T = jnp.concatenate([w2_blk, jnp.zeros((1, H * K), jnp.float32)], axis=0)
    b2c = jnp.concatenate([params["b2"].reshape(H, 1),
                           jnp.ones((1, 1), jnp.float32)], axis=0)        # last row -> ones

    h_aug = pl.pallas_call(
        _scoring_kernel,
        out_shape=jax.ShapeDtypeStruct((H + 1, Np), jnp.float32),
        grid=(Np // tile_score,),
        in_specs=[
            pl.BlockSpec((D, tile_score), lambda i: (0, i)),
            pl.BlockSpec((H * K, D), lambda i: (0, 0)),
            pl.BlockSpec((H * K, 1), lambda i: (0, 0)),
            pl.BlockSpec((H + 1, H * K), lambda i: (0, 0)),
            pl.BlockSpec((H + 1, 1), lambda i: (0, 0)),
        ],
        out_specs=pl.BlockSpec((H + 1, tile_score), lambda i: (0, i)),
        compiler_params=cparams_1d,
    )(xT, w1T, b1c, w2T, b2c)

    # ---- Edge stream: 1 byte/edge, src-major (transposed), sentinel R == "no edge". ----
    et_enc = jnp.where(adj_mask > 0, edge_type_dense.astype(jnp.int32), R).astype(jnp.int8)
    etT = jnp.full((Np, Np), R, dtype=jnp.int8).at[:N, :N].set(et_enc.T)  # (Np, Np)[src,dst]

    # ---- Tiny per-relation / per-layer / per-head logit table (leaky_relu folded). ----
    tbl = jnp.einsum("rp,lph->rlh", params["rel_emb"], params["attn_w"], precision=high)
    tbl = jnp.where(tbl >= 0, tbl, negative_slope * tbl)                  # (R, L, H)

    cent_row = jnp.zeros((1, Np), jnp.float32).at[0, :N].set(centrality)
    gamma_col = params["gamma"].reshape(H, 1)
    beta_col = params["beta"].reshape(H, 1)

    grid2 = (Np // tile_dst, Np // tile_src)
    out_row = None
    for l in range(num_layers):                     # one pallas_call per SA layer
        table_l = tbl[:, l, :]                      # (R, H)
        hin = h_aug.shape[0] - 1                    # H for layer 0, 1 afterwards
        in_specs = [
            pl.BlockSpec((R, H), lambda i, j: (0, 0)),            # relation logit table
            pl.BlockSpec((tile_src, tile_dst), lambda i, j: (j, i)),  # int8 edge types
            pl.BlockSpec((hin + 1, tile_src), lambda i, j: (0, j)),   # augmented src scores
        ]
        scratch = [pltpu.VMEM((R, hin + 1, tile_dst), jnp.float32)]
        if l != num_layers - 1:
            h_aug = pl.pallas_call(
                functools.partial(_sa_mid_kernel, rel_num=R, hin=hin),
                out_shape=jax.ShapeDtypeStruct((2, Np), jnp.float32),
                grid=grid2,
                in_specs=in_specs,
                out_specs=pl.BlockSpec((2, tile_dst), lambda i, j: (0, i)),
                scratch_shapes=scratch,
                compiler_params=cparams_2d,
            )(table_l, etT, h_aug)
        else:
            out_row = pl.pallas_call(
                functools.partial(_sa_last_kernel, rel_num=R, hin=hin),
                out_shape=jax.ShapeDtypeStruct((1, Np), jnp.float32),
                grid=grid2,
                in_specs=in_specs + [
                    pl.BlockSpec((1, tile_dst), lambda i, j: (0, i)),   # centrality
                    pl.BlockSpec((H, 1), lambda i, j: (0, 0)),          # gamma
                    pl.BlockSpec((H, 1), lambda i, j: (0, 0)),          # beta
                ],
                out_specs=pl.BlockSpec((1, tile_dst), lambda i, j: (0, i)),
                scratch_shapes=scratch,
                compiler_params=cparams_2d,
            )(table_l, etT, h_aug, cent_row, gamma_col, beta_col)

    return out_row[0, :N].reshape(N, 1)


# ------------------------------ parameters / reference ----------------------------
def init_params(key, *, in_dim, heads, pred_dim, rel_num, num_layers):
    half = int(0.5 * in_dim)
    H0 = heads[0]
    ks = jax.random.split(key, 4)
    params = dict(
        # scoring_nn (stacked over heads[0])
        w1=(jax.random.normal(ks[0], (H0, in_dim, half), jnp.float32)
            / jnp.sqrt(jnp.float32(in_dim))),
        b1=jnp.zeros((H0, half), jnp.float32),
        w2=(jax.random.normal(ks[1], (H0, half), jnp.float32)
            / jnp.sqrt(jnp.float32(half))),
        b2=jnp.zeros((H0, 1), jnp.float32),
        # rel_emb
        rel_emb=jax.random.normal(ks[2], (rel_num, pred_dim), jnp.float32),
        # SALayer attention vectors (one (pred_dim, heads) matrix per layer)
        attn_w=(jax.random.normal(ks[3], (num_layers, pred_dim, heads[0]), jnp.float32)
                / jnp.sqrt(jnp.float32(pred_dim))),
        # scale parameters: nn.init.ones_ / zeros_
        gamma=jnp.ones((1, heads[-2]), jnp.float32),
        beta=jnp.zeros((1, heads[-2]), jnp.float32),
    )
    return params


def _reference_forward(params, inputs, adj_mask, edge_type_dense, centrality,
                       *, num_layers, heads, negative_slope):
    """Pure-JAX (dense, per-edge) reference of the same forward pass."""
    high = jax.lax.Precision.HIGHEST
    H = heads[0]
    cols = []
    for hh in range(H):
        hid = jnp.maximum(jnp.dot(inputs, params["w1"][hh], precision=high)
                          + params["b1"][hh], 0.0)
        cols.append(jnp.dot(hid, params["w2"][hh], precision=high) + params["b2"][hh, 0])
    h = jnp.stack(cols, axis=-1)                                          # (N, H)

    tbl = jnp.einsum("rp,lph->rlh", params["rel_emb"], params["attn_w"], precision=high)
    tbl = jnp.where(tbl >= 0, tbl, negative_slope * tbl)

    mask3 = (adj_mask > 0)[:, :, None]
    for l in range(num_layers):
        logits = tbl[:, l, :][edge_type_dense]                            # (N, N, H)
        masked = jnp.where(mask3, logits, -1e30)
        m = jnp.max(masked, axis=1, keepdims=True)
        e = jnp.exp(masked - m) * mask3.astype(jnp.float32)
        denom = jnp.maximum(jnp.sum(e, axis=1, keepdims=True), 1e-30)
        alpha = e / denom                                                 # (N, N, H)
        h_new = jnp.maximum(jnp.einsum("dsh,sh->dh", alpha, h, precision=high), 0.0)
        if l != num_layers - 1:
            h = jnp.repeat(jnp.mean(h_new, axis=1, keepdims=True), H, axis=1)
        else:
            h = h_new
    scaled = (centrality[:, None] * params["gamma"] + params["beta"]) * h
    mo = jnp.mean(scaled, axis=1, keepdims=True)
    return jnp.where(mo >= 0, mo, 0.01 * mo)


if __name__ == "__main__":
    # N chosen so both grid axes have >1 tile (dst: 1024/256 = 4, src: 1024/512 = 2).
    N, in_dim = 1024, 32
    pred_dim, rel_num = 8, 5
    num_layers = 2
    heads = [4, 4, 4]          # heads[l] per SALayer; heads[-2] sizes gamma/beta
    negative_slope = 0.2

    key = jax.random.PRNGKey(0)
    k_x, k_adj, k_et, k_p = jax.random.split(key, 4)

    x = jax.random.normal(k_x, (N, in_dim), jnp.float32)
    adj = jax.random.bernoulli(k_adj, 0.02, (N, N))
    adj = jnp.logical_or(adj, jnp.eye(N, dtype=bool))          # self-loops
    adj_mask = adj.astype(jnp.float32)                         # adj_mask[dst, src]
    edge_type_dense = jax.random.randint(k_et, (N, N), 0, rel_num)
    centrality = jnp.log(jnp.sum(adj_mask, axis=1) + 1.0)      # (N,), log(in-degree+1)

    params = init_params(k_p, in_dim=in_dim, heads=heads, pred_dim=pred_dim,
                         rel_num=rel_num, num_layers=num_layers)

    out = geni_forward(params, x, adj_mask, edge_type_dense, centrality,
                       num_layers=num_layers, heads=heads,
                       negative_slope=negative_slope)
    jax.block_until_ready(out)
    assert out.shape == (N, 1) and bool(jnp.all(jnp.isfinite(out)))

    ref = _reference_forward(params, x, adj_mask, edge_type_dense, centrality,
                             num_layers=num_layers, heads=heads,
                             negative_slope=negative_slope)
    err = float(jnp.max(jnp.abs(out - ref)))
    assert err < 5e-3, f"kernel/reference mismatch: max abs err = {err}"
    print("KERNEL_OK")
</pallas_src>

<mosaic_0001>
module attributes {stable_mosaic.version = 11 : i64} {
  func.func @_scoring_kernel(%arg0: i32, %arg1: memref<32x512xf32, #tpu.memory_space<vmem>>, %arg2: memref<64x32xf32, #tpu.memory_space<vmem>>, %arg3: memref<64x1xf32, #tpu.memory_space<vmem>>, %arg4: memref<5x64xf32, #tpu.memory_space<vmem>>, %arg5: memref<5x1xf32, #tpu.memory_space<vmem>>, %arg6: memref<5x512xf32, #tpu.memory_space<vmem>>) attributes {dimension_semantics = [#tpu.dimension_semantics<parallel>], iteration_bounds = array<i64: 2>, scalar_prefetch = 0 : i64, scratch_operands = 0 : i64, tpu.core_type = #tpu.core_type<tc>, window_params = [{transform_indices = @transform_0, window_bounds = array<i64: 32, 512>}, {pipeline_mode = #tpu.pipeline_mode<synchronous>, transform_indices = @transform_1, window_bounds = array<i64: 64, 32>}, {pipeline_mode = #tpu.pipeline_mode<synchronous>, transform_indices = @transform_2, window_bounds = array<i64: 64, 1>}, {pipeline_mode = #tpu.pipeline_mode<synchronous>, transform_indices = @transform_3, window_bounds = array<i64: 5, 64>}, {pipeline_mode = #tpu.pipeline_mode<synchronous>, transform_indices = @transform_4, window_bounds = array<i64: 5, 1>}, {transform_indices = @transform_5, window_bounds = array<i64: 5, 512>}]} {
    %c0 = arith.constant 0 : index
    %c0_0 = arith.constant 0 : index
    %0 = vector.load %arg2[%c0, %c0_0] : memref<64x32xf32, #tpu.memory_space<vmem>>, vector<64x32xf32>
    %c0_1 = arith.constant 0 : index
    %c0_2 = arith.constant 0 : index
    %1 = vector.load %arg1[%c0_1, %c0_2] : memref<32x512xf32, #tpu.memory_space<vmem>>, vector<32x512xf32>
    %cst = arith.constant dense<0.000000e+00> : vector<64x512xf32>
    %2 = tpu.matmul %0, %1, %cst {dimension_numbers = #tpu.dot_dimension_numbers<[1], [0], [0], [1], [0, 0, 1, 1], [], []>} : vector<64x32xf32>, vector<32x512xf32>, vector<64x512xf32> -> vector<64x512xf32>
    %c0_3 = arith.constant 0 : index
    %c0_4 = arith.constant 0 : index
    %3 = vector.load %arg3[%c0_3, %c0_4] : memref<64x1xf32, #tpu.memory_space<vmem>>, vector<64x1xf32>
    %4 = vector.broadcast %3 : vector<64x1xf32> to vector<64x512xf32>
    %5 = arith.addf %2, %4 : vector<64x512xf32>
    %cst_5 = arith.constant 0.000000e+00 : f32
    %6 = vector.broadcast %cst_5 : f32 to vector<64x512xf32>
    %7 = arith.maximumf %5, %6 : vector<64x512xf32>
    %c0_6 = arith.constant 0 : index
    %c0_7 = arith.constant 0 : index
    %8 = vector.load %arg4[%c0_6, %c0_7] : memref<5x64xf32, #tpu.memory_space<vmem>>, vector<5x64xf32>
    %cst_8 = arith.constant dense<0.000000e+00> : vector<5x512xf32>
    %9 = tpu.matmul %8, %7, %cst_8 {dimension_numbers = #tpu.dot_dimension_numbers<[1], [0], [0], [1], [0, 0, 1, 1], [], []>} : vector<5x64xf32>, vector<64x512xf32>, vector<5x512xf32> -> vector<5x512xf32>
    %c0_9 = arith.constant 0 : index
    %c0_10 = arith.constant 0 : index
    %10 = vector.load %arg5[%c0_9, %c0_10] : memref<5x1xf32, #tpu.memory_space<vmem>>, vector<5x1xf32>
    %11 = vector.broadcast %10 : vector<5x1xf32> to vector<5x512xf32>
    %12 = arith.addf %9, %11 : vector<5x512xf32>
    %c0_11 = arith.constant 0 : index
    %c0_12 = arith.constant 0 : index
    %13 = vector.load %arg6[%c0_11, %c0_12] : memref<5x512xf32, #tpu.memory_space<vmem>>, vector<5x512xf32>
    tpu.vector_store %arg6[%c0_11, %c0_12], %12 {strides = array<i32>} : memref<5x512xf32, #tpu.memory_space<vmem>>, vector<5x512xf32>,
    return
  }
  func.func @transform_0(%arg0: i32) -> (i32, i32) {
    %c0_i32 = arith.constant 0 : i32
    %c0_i32_0 = arith.constant 0 : i32
    return %c0_i32, %arg0 : i32, i32
  }
  func.func @transform_1(%arg0: i32) -> (i32, i32) {
    %c0_i32 = arith.constant 0 : i32
    %c0_i32_0 = arith.constant 0 : i32
    %c0_i32_1 = arith.constant 0 : i32
    return %c0_i32, %c0_i32_0 : i32, i32
  }
  func.func @transform_2(%arg0: i32) -> (i32, i32) {
    %c0_i32 = arith.constant 0 : i32
    %c0_i32_0 = arith.constant 0 : i32
    %c0_i32_1 = arith.constant 0 : i32
    return %c0_i32, %c0_i32_0 : i32, i32
  }
  func.func @transform_3(%arg0: i32) -> (i32, i32) {
    %c0_i32 = arith.constant 0 : i32
    %c0_i32_0 = arith.constant 0 : i32
    %c0_i32_1 = arith.constant 0 : i32
    return %c0_i32, %c0_i32_0 : i32, i32
  }
  func.func @transform_4(%arg0: i32) -> (i32, i32) {
    %c0_i32 = arith.constant 0 : i32
    %c0_i32_0 = arith.constant 0 : i32
    %c0_i32_1 = arith.constant 0 : i32
    return %c0_i32, %c0_i32_0 : i32, i32
  }
  func.func @transform_5(%arg0: i32) -> (i32, i32) {
    %c0_i32 = arith.constant 0 : i32
    %c0_i32_0 = arith.constant 0 : i32
    return %c0_i32, %arg0 : i32, i32
  }
}

</mosaic_0001>

<bundles_post_ra>
// kernel: tpu_custom_call.1
= control target key start
LH: loop header
LB: loop body
LE: loop exit
PB: predicated region body
PF: predicated region fallthrough
CT: control target
= control target key end

     0   :  { %10 = vsyncpa [#allocation3], 0  ;;  %s1381_s0 = inlined_call_operand.hbm [shape: f32[32,1024], index: 0, kind: input, shape index: {}]   ;;  %s1382_s1 = inlined_call_operand.vmem [shape: f32[64,32], index: 1, kind: input, shape index: {}]   ;;  %s1383_s2 = inlined_call_operand.vmem [shape: f32[64,1], index: 2, kind: input, shape index: {}]   ;;  %s1384_s3 = inlined_call_operand.vmem [shape: f32[5,64], index: 3, kind: input, shape index: {}]   ;;  %s1385_s4 = inlined_call_operand.vmem [shape: f32[5,1], index: 4, kind: input, shape index: {}]   ;;  %s1386_s5 = inlined_call_operand.hbm [shape: f32[5,1024], index: 5, kind: output, shape index: {}]  }
   0x1   :  { %12 = vsyncpa [#allocation3 + $0x1], 0 }
   0x2   :  { %13 = vsyncpa [#allocation4], 0 }
   0x3   :  { %15 = vsyncpa [#allocation4 + $0x1], 0  ;;  %s1112_s18 = smov 0   ;;  %s1114_s19 = smov 0  }
   0x4   :  { %s1116_s20 = smov 0   ;;  %s1118_s21 = smov 0  }
   0x5 LB: > { %s1133_s22 = sadd.s32 4294967295, %s1073_s21   ;;  %s842_s23 = sadd.s32 4294967294, %s1073_s21   ;;  %s1073_s21 = sphi %s1118_s21, %s1400_s21   ;;  %s1069_s20 = sphi %s1116_s20, %s1399_s20   ;;  %s1065_s19 = sphi %s1114_s19, %s1398_s19   ;;  %s1061_s18 = sphi %s1112_s18, %s1397_s18  }
   0x6   : > { %s1137_s24 = sadd.s32 1, %s1073_s21   ;;  %s28_s25 = sadd.s32 1, %s1069_s20 }
   0x7   : > { %s25_s26 = ssub.s32 %s1073_s21, %s1137_s24  ;;  %p35_p0 = scmp.ne.s32.totalorder %s1069_s20, %s1065_s19 }
   0x8   : > { %p26_p1 = scmp.eq.s32.totalorder %s25_s26, 0  ;;  %p36_p2 = scmp.eq.s32.totalorder %s1073_s21, 0 }
   0x9   : > { %p41_p3 = scmp.ne.s32.totalorder %s1065_s19, %s1061_s18  ;;  %p42_p4 = scmp.eq.s32.totalorder %s1133_s22, 0 }
   0xa   : > { %s1149_s27 = scalar_select %p26_p1, %s1069_s20, %s28_s25  }
   0xb   : > { %p1151_p5 = por %p36_p2, %p35_p0  ;;  %p1155_p6 = por %p42_p4, %p41_p3 }
   0xc   : > { %p149_p7 = scmp.eq.s32.totalorder %s1133_s22, 1  ;;  %p155_p8 = scmp.eq.s32.totalorder %s842_s23, 1 }
   0xd   : > { %p936_p10 = scmp.lt.s32.totalorder %s1073_s21, 2  ;;  %s187_s7 = sand.u32 1, %s1069_s20  }
   0xe   : > { %p1162_p11 = por %p149_p7, %p35_p0  ;;  %p1166_p12 = por %p155_p8, %p41_p3 }
   0xf   : > { %s874_s8 = sshll.u32 %s1073_s21, 9  ;;  %s845_s9 = sshll.u32 %s187_s7, 7 }
  0x10   : > { %s1390_s30 = scalar_select %p1162_p11, 1, 0 }
  0x11   : > { %s1391_s6 = scalar_select %p1166_p12, 1, 0 }
  0x12   : > { %s1175_s12 = scalar_lea.hbm %s1381_s0, %s874_s8  ;;  %s191_s13 = scalar_lea.vmem [#allocation2], %s845_s9 }
  0x13   : > { %s198_s14 = sshll.u32 %s191_s13, 4  ;;  %p1179_p13 = pnand %p936_p10, %p1151_p5  ;;  %s1183_s14 = int_to_ptr.vmem [resolvable:$true] %s198_s14 }
  0x14   : > { %s1186_s16 = scalar_lea.sflag [#allocation3], %s187_s7  ;;  %s977_s17 = scalar_lea.hbm %s1175_s12, 2048 }
  0x15   : > { %p978_p1 = scmp.ne.s32.totalorder %s1175_s12, %s977_s17  ;;  %p979_p2 = pneg %p1179_p13 }
  0x16   : > { %s982_s26 = scalar_lea.hbm %s1381_s0, 4096  ;;  %p983_p5 = scmp.lt.u32.totalorder %s1175_s12, %s1381_s0 }
  0x17   : > { %p980_p3 = pnand %p979_p2, %p978_p1  ;;  %p984_p7 = scmp.lt.u32.totalorder %s982_s26, %s977_s17 }
  0x18   : > { %p986_p10 = scmp.lt.u32.totalorder %s977_s17, %s1175_s12 }
  0x19   : > { %p981_p4 = pneg %p980_p3  ;;  %p985_p8 = por %p984_p7, %p983_p5 }
  0x1b   : > { %p987_p9 = por %p986_p10, %p985_p8 }
  0x1d   : > { %p988_p0 = pnand %p987_p9, %p981_p4 }
  0x1f   : > { %991 = shalt.err (!%p988_p0)
}
  0x20   : > { %s992_s7 = scalar_lea.vmem %s1183_s14, 2048  ;;  %s1075_s9 = smov [#allocation2]  }
  0x21   : > { %p993_p1 = scmp.ne.s32.totalorder %s1183_s14, %s992_s7  ;;  %s997_s10 = sshll.u32 %s1075_s9, 4  ;;  %s998_s10 = int_to_ptr.vmem [resolvable:$false] %s997_s10 }
  0x22   : > { %s999_s11 = scalar_lea.vmem %s998_s10, 4096  ;;  %p1000_p11 = scmp.lt.s32.totalorder %s1183_s14, %s998_s10 }
  0x23   : > { %p995_p3 = pnand %p993_p1, %p979_p2  ;;  %p1001_p5 = scmp.lt.s32.totalorder %s999_s11, %s992_s7 }
  0x25   : > { %p996_p12 = pneg %p995_p3  ;;  %p1002_p7 = por %p1001_p5, %p1000_p11 }
  0x27   : > { %p1003_p8 = pnand %p1002_p7, %p996_p12 }
  0x29   : > { %1006 = shalt.err (!%p1003_p8)
}
  0x2a   : > { %s1076_s13 = smov 1024   ;;  %s1077_s17 = smov 512  }
  0x2b   : > { %s1078_s23 = smov 32   ;;  %p206_p9 = scmp.lt.s32.totalorder %s1073_s21, 3 }
  0x2c   : > { %931 = dma.hbm_to_vmem [thread:$0]  (!%p1179_p13), %s1175_s12, 2048, %s1183_s14, %s1186_s16, %s1076_s13, %s1077_s17, %s1078_s23  }
  0x2d   : > { %p1393_p0 = scmp.ge.s32.totalorder %s1073_s21, 1 }
  0x2f   : > { %p207_p2 = pnand %p1393_p0, %p206_p9 }
  0x30   : > { %s1218_s25 = sand.u32 (!%p207_p2), 1, %s1065_s19  }
  0x31   : > { %210 = sbr.rel (%p207_p2) target bundleno = 550 (0x226), region = 40  ;;  %s849_s26 = sshll.u32 (!%p207_p2), %s1218_s25, 7 }
  0x32   : > { %s213_s28 = scalar_lea.sflag (!%p207_p2), [#allocation3], %s1218_s25  ;;  %s1222_s8 = scalar_lea.vmem (!%p207_p2), [#allocation2], %s849_s26 }
  0x38   : > { %1052 = dma.done.wait (%p1155_p6), %s213_s28, 2048  }
  0x39   : > { %1054 = vsyncadd (%p1155_p6), %s213_s28, 4294965248  ;;  %v1079_v0 = vmov 0.0   ;;  %v1080_v1 = vmov 0   ;;  %v254_v2 = vld [vmem:[%s1222_s8 + $0x8] sm:$0xff]  ;;  %v256_v4 = vld [vmem:[%s1222_s8 + $0x18] sm:$0xff]  ;;  %vm317_vm0 = vcmask 261120  }
  0x3a   : > { %406 = vmatprep.mubr.f32.mxu0 %v1079_v0  ;;  %519 = vmatprep.mubr.f32.mxu1 %v1079_v0  ;;  %v258_v3 = vld [vmem:[%s1222_s8 + $0x28] sm:$0xff]  ;;  %v260_v6 = vld [vmem:[%s1222_s8 + $0x38] sm:$0xff]  ;;  %v253_v7 = vld [vmem:[%s1222_s8] sm:$0xff]  ;;  %vm607_vm1 = vcmask 523264   ;;  %s850_s9 = sshll.u32 %s1218_s25, 5  ;;  %s875_s10 = sshll.u32 %s1133_s22, 9 }
  0x3b   : > { %975 = vset.pattern.permute.xlu0 %v1080_v1  ;;  %976 = vset.pattern.permute.xlu1 %v1080_v1  ;;  %v876_v5 = vpack.c.bf16 %v258_v3, %v254_v2  ;;  %v257_v8 = vld [vmem:[%s1222_s8 + $0x20] sm:$0xff]  ;;  %v884_v9 = vpack.c.bf16 %v260_v6, %v256_v4  ;;  %v255_v11 = vld [vmem:[%s1222_s8 + $0x10] sm:$0xff]  ;;  %v262_v13 = vld [vmem:[%s1222_s8 + $0x48] sm:$0xff]  ;;  %s242_s11 = scalar_lea.vmem [#allocation5], %s850_s9  ;;  %s1337_s26 = scalar_lea.hbm %s1386_s5, %s875_s10 }
  0x3c   : > { %v878_v10 = vpack.c.bf16 %v257_v8, %v253_v7  ;;  %v259_v12 = vld [vmem:[%s1222_s8 + $0x30] sm:$0xff]  ;;  %v266_v15 = vld [vmem:[%s1222_s8 + $0x68] sm:$0xff]  ;;  %v264_v16 = vld [vmem:[%s1222_s8 + $0x58] sm:$0xff]  ;;  %s772_s13 = sshll.u32 %s242_s11, 4  ;;  %s758_s22 = scalar_lea.sflag [#allocation4], %s1218_s25  ;;  %s1339_s13 = int_to_ptr.vmem [resolvable:$true] %s772_s13 }
  0x3d   : > { %877 = vmatprep.subr.bf16.mxu0 %v876_v5  ;;  %v886_v14 = vpack.c.bf16 %v259_v12, %v255_v11  ;;  %v268_v17 = vld [vmem:[%s1222_s8 + $0x78] sm:$0xff]  ;;  %885 = vmatprep.subr.bf16.mxu1 %v884_v9  ;;  %v880_v18 = vpack.c.bf16 %v266_v15, %v262_v13  ;;  %v261_v20 = vld [vmem:[%s1222_s8 + $0x40] sm:$0xff]  ;;  %v263_v22 = vld [vmem:[%s1222_s8 + $0x50] sm:$0xff]  ;;  %s1007_s28 = scalar_lea.vmem %s1339_s13, 512  ;;  %p1394_p11 = scmp.ne.s32.totalorder %s1390_s30, 0 }
  0x3e   : > { %879 = vmatpush1.bf16.msra.mxu0 %v878_v10  ;;  %v888_v19 = vpack.c.bf16 %v268_v17, %v264_v16  ;;  %v265_v21 = vld [vmem:[%s1222_s8 + $0x60] sm:$0xff]  ;;  %v267_v24 = vld [vmem:[%s1222_s8 + $0x70] sm:$0xff]  ;;  %v270_v29 = vld [vmem:[%s1383_s2 + $0x8] sm:$0xff]  ;;  %p1008_p6 = scmp.ne.s32.totalorder %s1339_s13, %s1007_s28  ;;  %s1081_s8 = smov [#allocation5]  }
  0x3f   : > { %887 = vmatpush1.bf16.msra.mxu1 %v886_v14  ;;  %v882_v23 = vpack.c.bf16 %v265_v21, %v261_v20  ;;  %881 = vmatprep.subr.bf16.mxu0 %v880_v18  ;;  %v890_v25 = vpack.c.bf16 %v267_v24, %v263_v22  ;;  %v245_v26 = vld [vmem:[%s1382_s1] sm:$0xff]  ;;  %v271_v28 = vld [vmem:[%s1383_s2 + $0x10] sm:$0xff]  ;;  %v272_v30 = vld [vmem:[%s1383_s2 + $0x18] sm:$0xff]  ;;  %s1011_s29 = sshll.u32 %s1081_s8, 4  ;;  %s1012_s29 = int_to_ptr.vmem [resolvable:$false] %s1011_s29 }
  0x40   : > { %889 = vmatprep.subr.bf16.mxu1 %v888_v19  ;;  %v269_v27 = vld [vmem:[%s1383_s2] sm:$0xff]  ;;  %289 = vperm.xlu1 %976, %v271_v28   ;;  %v246_v31 = vld [vmem:[%s1382_s1 + $0x8] sm:$0xff]  ;;  %v247_v34 = vld [vmem:[%s1382_s1 + $0x10] sm:$0xff]  ;;  %p1009_p12 = pnand %p1008_p6, %p1394_p11  ;;  %s1013_s12 = scalar_lea.vmem %s1012_s29, 1024 }
  0x41   : > { %279 = vperm.xlu0 %975, %v269_v27   ;;  %v273_v32 = vld [vmem:[%s1383_s2 + $0x20] sm:$0xff]  ;;  %v274_v33 = vld [vmem:[%s1383_s2 + $0x28] sm:$0xff]  ;;  %v275_v35 = vld [vmem:[%s1383_s2 + $0x30] sm:$0xff]  ;;  %p1014_p4 = scmp.lt.s32.totalorder %s1339_s13, %s1012_s29  ;;  %p1015_p10 = scmp.lt.s32.totalorder %s1013_s12, %s1007_s28 }
  0x42   : > { %883 = vmatpush1.bf16.msra.mxu0 %v882_v23  ;;  %v276_v36 = vld [vmem:[%s1383_s2 + $0x38] sm:$0xff]  ;;  %v601_v38 = vld [vmem:[%s1385_s4] sm:$0x1f]  ;;  %v250_v40 = vld [vmem:[%s1382_s1 + $0x28] sm:$0xff]  ;;  %p1010_p13 = pneg %p1009_p12 }
  0x43   : > { %891 = vmatpush1.bf16.msra.mxu1 %v890_v25  ;;  %v248_v37 = vld [vmem:[%s1382_s1 + $0x18] sm:$0xff]  ;;  %v249_v39 = vld [vmem:[%s1382_s1 + $0x20] sm:$0xff]  ;;  %v251_v41 = vld [vmem:[%s1382_s1 + $0x30] sm:$0xff]  ;;  %p1016_p1 = por %p1015_p10, %p1014_p4 }
  0x44   : > { %294 = vperm.xlu1 %976, %v272_v30   ;;  %v252_v42 = vld [vmem:[%s1382_s1 + $0x38] sm:$0xff] }
  0x45   : > { %851 = vmatmul.mubr.msk.f32.vlgmr.msra.gmra.mrb[0].mxu0 %vm317_vm0, %v245_v26  ;;  %284 = vperm.xlu0 %975, %v270_v29   ;;  %p1017_p3 = pnand %p1016_p1, %p1010_p13 }
  0x46   : > { %859 = vmatmul.mubr.msk.f32.vlgmr.msra.gmra.mrb[0].mxu1 %vm317_vm0, %v245_v26  ;;  %412 = vmatprep.mubr.f32.mxu0 %v1079_v0 }
  0x47   : > { %525 = vmatprep.mubr.f32.mxu1 %v1079_v0 }
  0x48   : > { %304 = vperm.xlu1 %976, %v274_v33  }
  0x49   : > { %852 = vmatmul.mubr.msk.f32.gmra.mrb[2].mxu0 %vm317_vm0, %v246_v31  ;;  %299 = vperm.xlu0 %975, %v273_v32  }
  0x4a   : > { %860 = vmatmul.mubr.msk.f32.gmra.mrb[2].mxu1 %vm317_vm0, %v246_v31  ;;  %418 = vmatprep.mubr.f32.mxu0 %v1079_v0 }
  0x4b   : > { %531 = vmatprep.mubr.f32.mxu1 %v1079_v0 }
  0x4c   : > { %314 = vperm.xlu1 %976, %v276_v36  }
  0x4d   : > { %853 = vmatmul.mubr.msk.f32.gmra.mrb[4].mxu0 %vm317_vm0, %v247_v34  ;;  %309 = vperm.xlu0 %975, %v275_v35  }
  0x4e   : > { %861 = vmatmul.mubr.msk.f32.gmra.mrb[4].mxu1 %vm317_vm0, %v247_v34  ;;  %424 = vmatprep.mubr.f32.mxu0 %v1079_v0 }
  0x4f   : > { %537 = vmatprep.mubr.f32.mxu1 %v1079_v0 }
  0x51   : > { %854 = vmatmul.mubr.msk.f32.gmra.mrb[6].mxu0 %vm317_vm0, %v248_v37  ;;  %604 = vperm.xlu0 %975, %v601_v38  }
  0x52   : > { %862 = vmatmul.mubr.msk.f32.gmra.mrb[6].mxu1 %vm317_vm0, %v248_v37  ;;  %430 = vmatprep.mubr.f32.mxu0 %v1079_v0 }
  0x53   : > { %543 = vmatprep.mubr.f32.mxu1 %v1079_v0 }
  0x55   : > { %855 = vmatmul.mubr.msk.f32.gmra.mrb[8].mxu0 %vm317_vm0, %v249_v39 }
  0x56   : > { %863 = vmatmul.mubr.msk.f32.gmra.mrb[8].mxu1 %vm317_vm0, %v249_v39  ;;  %436 = vmatprep.mubr.f32.mxu0 %v1079_v0 }
  0x57   : > { %549 = vmatprep.mubr.f32.mxu1 %v1079_v0 }
  0x59   : > { %856 = vmatmul.mubr.msk.f32.gmra.mrb[10].mxu0 %vm317_vm0, %v250_v40 }
  0x5a   : > { %864 = vmatmul.mubr.msk.f32.gmra.mrb[10].mxu1 %vm317_vm0, %v250_v40  ;;  %442 = vmatprep.mubr.f32.mxu0 %v1079_v0 }
  0x5b   : > { %555 = vmatprep.mubr.f32.mxu1 %v1079_v0 }
  0x5d   : > { %857 = vmatmul.mubr.msk.f32.gmra.mrb[12].mxu0 %vm317_vm0, %v251_v41 }
  0x5e   : > { %865 = vmatmul.mubr.msk.f32.gmra.mrb[12].mxu1 %vm317_vm0, %v251_v41  ;;  %448 = vmatprep.mubr.f32.mxu0 %v1079_v0 }
  0x5f   : > { %561 = vmatprep.mubr.f32.mxu1 %v1079_v0 }
  0x61   : > { %858 = vmatmul.mubr.msk.f32.gmra.mrb[14].mxu0 %vm317_vm0, %v252_v42 }
  0x62   : > { %866 = vmatmul.mubr.msk.f32.gmra.mrb[14].mxu1 %vm317_vm0, %v252_v42  ;;  %675 = vmatprep.mubr.f32.mxu0 %v1079_v0 }
  0x63   : > { %746 = vmatprep.mubr.f32.mxu1 %v1079_v0 }
  0xbf   : > { %v290_v57 = vpop.permute.xlu1 %289 }
  0xc0   : > { %v280_v43 = vpop.permute.xlu0 %279 }
  0xc3   : > { %v295_v15 = vpop.permute.xlu1 %294 }
  0xc4   : > { %v285_v49 = vpop.permute.xlu0 %284 }
  0xc8   : > { %v300_v39 = vpop.permute.xlu0 %299 }
 0x118   : > { %v408_v44 = vpop.f32.mrb[0].mxu0 }
 0x119   : > { %v521_v45 = vpop.f32.mrb[0].mxu1  ;;  %v410_v46 = vpop.f32.mrb[1].mxu0  ;;  %v409_v48 = vadd.f32 %v408_v44, %v280_v43 }
 0x11a   : > { %v523_v47 = vpop.f32.mrb[1].mxu1  ;;  %v522_v50 = vadd.f32 %v521_v45, %v280_v43  ;;  %v411_v51 = vadd.f32 %v410_v46, %v280_v43  ;;  %v305_v45 = vpop.permute.xlu1 %304 }
 0x11b   : > { %v524_v53 = vadd.f32 %v523_v47, %v280_v43  ;;  %v568_v61 = vmax.f32 %v409_v48, 0.0 }
 0x11c   : > { %v414_v52 = vpop.f32.mrb[2].mxu0  ;;  %v570_v0 = vmax.f32 %v522_v50, 0.0  ;;  %v569_v1 = vmax.f32 %v411_v51, 0.0 }
 0x11d   : > { %v415_v54 = vadd.f32 %v414_v52, %v285_v49  ;;  %v527_v55 = vpop.f32.mrb[2].mxu1  ;;  %v416_v56 = vpop.f32.mrb[3].mxu0  ;;  %v571_v5 = vmax.f32 %v524_v53, 0.0 }
 0x11e   : > { %v528_v58 = vadd.f32 %v527_v55, %v285_v49  ;;  %v417_v59 = vadd.f32 %v416_v56, %v285_v49  ;;  %v529_v60 = vpop.f32.mrb[3].mxu1 }
 0x11f   : > { %v572_v62 = vmax.f32 %v415_v54, 0.0  ;;  %v530_v63 = vadd.f32 %v529_v60, %v285_v49 }
 0x120   : > { %v574_v2 = vmax.f32 %v528_v58, 0.0  ;;  %v573_v3 = vmax.f32 %v417_v59, 0.0  ;;  %v420_v4 = vpop.f32.mrb[4].mxu0 }
 0x121   : > { %v894_v6 = vpack.c.bf16 %v572_v62, %v568_v61  ;;  %v575_v7 = vmax.f32 %v530_v63, 0.0  ;;  %v533_v8 = vpop.f32.mrb[4].mxu1  ;;  %v422_v9 = vpop.f32.mrb[5].mxu0  ;;  %v421_v14 = vadd.f32 %v420_v4, %v290_v57 }
 0x122   : > { %v910_v10 = vpack.c.bf16 %v574_v2, %v570_v0  ;;  %v892_v11 = vpack.c.bf16 %v573_v3, %v569_v1  ;;  %v535_v12 = vpop.f32.mrb[5].mxu1  ;;  %v534_v16 = vadd.f32 %v533_v8, %v290_v57  ;;  %v423_v17 = vadd.f32 %v422_v9, %v290_v57 }
 0x123   : > { %v908_v13 = vpack.c.bf16 %v575_v7, %v571_v5  ;;  %v536_v19 = vadd.f32 %v535_v12, %v290_v57  ;;  %v576_v26 = vmax.f32 %v421_v14, 0.0  ;;  %v310_v5 = vpop.permute.xlu0 %309 }
 0x124   : > { %v426_v18 = vpop.f32.mrb[6].mxu0  ;;  %893 = vmatprep.subr.bf16.mxu0 %v892_v11  ;;  %v578_v29 = vmax.f32 %v534_v16, 0.0  ;;  %v577_v30 = vmax.f32 %v423_v17, 0.0  ;;  %v315_v11 = vpop.permute.xlu1 %314 }
 0x125   : > { %v427_v20 = vadd.f32 %v426_v18, %v295_v15  ;;  %v539_v21 = vpop.f32.mrb[6].mxu1  ;;  %909 = vmatprep.subr.bf16.mxu1 %v908_v13  ;;  %v428_v22 = vpop.f32.mrb[7].mxu0  ;;  %895 = vmatpush1.bf16.msra.mxu0 %v894_v6  ;;  %v579_v34 = vmax.f32 %v536_v19, 0.0 }
 0x126   : > { %v540_v23 = vadd.f32 %v539_v21, %v295_v15  ;;  %v429_v24 = vadd.f32 %v428_v22, %v295_v15  ;;  %v541_v25 = vpop.f32.mrb[7].mxu1  ;;  %911 = vmatpush1.bf16.msra.mxu1 %v910_v10 }
 0x127   : > { %v580_v27 = vmax.f32 %v427_v20, 0.0  ;;  %v542_v28 = vadd.f32 %v541_v25, %v295_v15 }
 0x128   : > { %v582_v31 = vmax.f32 %v540_v23, 0.0  ;;  %v581_v32 = vmax.f32 %v429_v24, 0.0  ;;  %v432_v33 = vpop.f32.mrb[8].mxu0 }
 0x129   : > { %v898_v35 = vpack.c.bf16 %v580_v27, %v576_v26  ;;  %v583_v36 = vmax.f32 %v542_v28, 0.0  ;;  %v545_v37 = vpop.f32.mrb[8].mxu1  ;;  %v434_v38 = vpop.f32.mrb[9].mxu0  ;;  %v433_v44 = vadd.f32 %v432_v33, %v300_v39 }
 0x12a   : > { %v914_v40 = vpack.c.bf16 %v582_v31, %v578_v29  ;;  %v896_v41 = vpack.c.bf16 %v581_v32, %v577_v30  ;;  %v547_v42 = vpop.f32.mrb[9].mxu1  ;;  %v546_v46 = vadd.f32 %v545_v37, %v300_v39  ;;  %v435_v47 = vadd.f32 %v434_v38, %v300_v39 }
 0x12b   : > { %v912_v43 = vpack.c.bf16 %v583_v36, %v579_v34  ;;  %v548_v49 = vadd.f32 %v547_v42, %v300_v39  ;;  %v584_v56 = vmax.f32 %v433_v44, 0.0  ;;  %v605_v36 = vpop.permute.xlu0 %604 }
 0x12c   : > { %v438_v48 = vpop.f32.mrb[10].mxu0  ;;  %897 = vmatprep.subr.bf16.mxu0 %v896_v41  ;;  %v586_v59 = vmax.f32 %v546_v46, 0.0  ;;  %v585_v60 = vmax.f32 %v435_v47, 0.0 }
 0x12d   : > { %v439_v50 = vadd.f32 %v438_v48, %v305_v45  ;;  %v551_v51 = vpop.f32.mrb[10].mxu1  ;;  %913 = vmatprep.subr.bf16.mxu1 %v912_v43  ;;  %v440_v52 = vpop.f32.mrb[11].mxu0  ;;  %899 = vmatpush1.bf16.msra.mxu0 %v898_v35  ;;  %v587_v0 = vmax.f32 %v548_v49, 0.0  ;;  %v600_v35 = vld [vmem:[%s1384_s3] sm:$0x1f] }
 0x12e   : > { %v552_v53 = vadd.f32 %v551_v51, %v305_v45  ;;  %v441_v54 = vadd.f32 %v440_v52, %v305_v45  ;;  %v553_v55 = vpop.f32.mrb[11].mxu1  ;;  %915 = vmatpush1.bf16.msra.mxu1 %v914_v40 }
 0x12f   : > { %v588_v57 = vmax.f32 %v439_v50, 0.0  ;;  %v554_v58 = vadd.f32 %v553_v55, %v305_v45 }
 0x130   : > { %v590_v61 = vmax.f32 %v552_v53, 0.0  ;;  %v589_v62 = vmax.f32 %v441_v54, 0.0  ;;  %v444_v63 = vpop.f32.mrb[12].mxu0 }
 0x131   : > { %v902_v1 = vpack.c.bf16 %v588_v57, %v584_v56  ;;  %v591_v2 = vmax.f32 %v554_v58, 0.0  ;;  %v557_v3 = vpop.f32.mrb[12].mxu1  ;;  %v446_v4 = vpop.f32.mrb[13].mxu0  ;;  %v445_v10 = vadd.f32 %v444_v63, %v310_v5 }
 0x132   : > { %v918_v6 = vpack.c.bf16 %v590_v61, %v586_v59  ;;  %v900_v7 = vpack.c.bf16 %v589_v62, %v585_v60  ;;  %v559_v8 = vpop.f32.mrb[13].mxu1  ;;  %v558_v12 = vadd.f32 %v557_v3, %v310_v5  ;;  %v447_v13 = vadd.f32 %v446_v4, %v310_v5 }
 0x133   : > { %v916_v9 = vpack.c.bf16 %v591_v2, %v587_v0  ;;  %v560_v15 = vadd.f32 %v559_v8, %v310_v5  ;;  %v592_v22 = vmax.f32 %v445_v10, 0.0 }
 0x134   : > { %v450_v14 = vpop.f32.mrb[14].mxu0  ;;  %901 = vmatprep.subr.bf16.mxu0 %v900_v7  ;;  %v594_v25 = vmax.f32 %v558_v12, 0.0  ;;  %v593_v26 = vmax.f32 %v447_v13, 0.0 }
 0x135   : > { %v451_v16 = vadd.f32 %v450_v14, %v315_v11  ;;  %v563_v17 = vpop.f32.mrb[14].mxu1  ;;  %917 = vmatprep.subr.bf16.mxu1 %v916_v9  ;;  %v452_v18 = vpop.f32.mrb[15].mxu0  ;;  %903 = vmatpush1.bf16.msra.mxu0 %v902_v1  ;;  %v595_v29 = vmax.f32 %v560_v15, 0.0 }
 0x136   : > { %v564_v19 = vadd.f32 %v563_v17, %v315_v11  ;;  %v453_v20 = vadd.f32 %v452_v18, %v315_v11  ;;  %v565_v21 = vpop.f32.mrb[15].mxu1  ;;  %919 = vmatpush1.bf16.msra.mxu1 %v918_v6 }
 0x137   : > { %v596_v23 = vmax.f32 %v451_v16, 0.0  ;;  %v566_v24 = vadd.f32 %v565_v21, %v315_v11 }
 0x138   : > { %v598_v27 = vmax.f32 %v564_v19, 0.0  ;;  %v597_v28 = vmax.f32 %v453_v20, 0.0 }
 0x139   : > { %v906_v30 = vpack.c.bf16 %v596_v23, %v592_v22  ;;  %v599_v31 = vmax.f32 %v566_v24, 0.0 }
 0x13a   : > { %v922_v32 = vpack.c.bf16 %v598_v27, %v594_v25  ;;  %v904_v33 = vpack.c.bf16 %v597_v28, %v593_v26 }
 0x13b   : > { %v920_v34 = vpack.c.bf16 %v599_v31, %v595_v29 }
 0x13c   : > { %905 = vmatprep.subr.bf16.mxu0 %v904_v33 }
 0x13d   : > { %921 = vmatprep.subr.bf16.mxu1 %v920_v34  ;;  %907 = vmatpush1.bf16.msra.mxu0 %v906_v30 }
 0x13e   : > { %923 = vmatpush1.bf16.msra.mxu1 %v922_v32 }
 0x140   : > { %867 = vmatmul.mubr.msk.f32.vlgmr.msra.gmra.mrb[16].mxu0 %vm607_vm1, %v600_v35 }
 0x141   : > { %868 = vmatmul.mubr.msk.f32.vlgmr.msra.gmra.mrb[16].mxu1 %vm607_vm1, %v600_v35 }
 0x213   : > { %v677_v37 = vpop.f32.mrb[16].mxu0 }
 0x214   : > { %v678_v38 = vadd.f32 %v677_v37, %v605_v36  ;;  %v748_v39 = vpop.f32.mrb[16].mxu1  ;;  %v679_v40 = vpop.f32.mrb[17].mxu0 }
 0x215   : > { %v749_v41 = vadd.f32 %v748_v39, %v605_v36  ;;  %v680_v42 = vadd.f32 %v679_v40, %v605_v36  ;;  %v750_v43 = vpop.f32.mrb[17].mxu1 }
 0x216   : > { %753 = vst [vmem:[%s242_s11] sm:$0x1f] %v678_v38  ;;  %v751_v44 = vadd.f32 %v750_v43, %v605_v36 }
 0x217   : > { %755 = vst [vmem:[%s242_s11 + $0x10] sm:$0x1f] %v749_v41  ;;  %754 = vst [vmem:[%s242_s11 + $0x8] sm:$0x1f] %v680_v42 }
 0x218   : > { %756 = vst [vmem:[%s242_s11 + $0x18] sm:$0x1f] %v751_v44 }
 0x219   : > { %1020 = shalt.err (!%p1017_p3)
}
 0x21a   : > { %s1021_s25 = scalar_lea.hbm %s1337_s26, 512  ;;  %s1025_s16 = scalar_lea.hbm %s1386_s5, 1024 }
 0x21b   : > { %p1022_p5 = scmp.ne.s32.totalorder %s1337_s26, %s1021_s25  ;;  %p1026_p9 = scmp.lt.u32.totalorder %s1337_s26, %s1386_s5 }
 0x21c   : > { %p1027_p0 = scmp.lt.u32.totalorder %s1025_s16, %s1021_s25  ;;  %p1029_p6 = scmp.lt.u32.totalorder %s1021_s25, %s1337_s26 }
 0x21d   : > { %p1023_p7 = pnand %p1022_p5, %p1394_p11 }
 0x21e   : > { %p1028_p2 = por %p1027_p0, %p1026_p9 }
 0x21f   : > { %p1024_p8 = pneg %p1023_p7 }
 0x220   : > { %p1030_p12 = por %p1029_p6, %p1028_p2 }
 0x222   : > { %p1031_p13 = pnand %p1030_p12, %p1024_p8 }
 0x224   : > { %1034 = shalt.err (!%p1031_p13)
}
 0x225   : > { %926 = dma.vmem_to_hbm [thread:$0]  (%p1394_p11), %s1339_s13, 512, %s1337_s26, %s758_s22  }
 0x226 PF: > { %s784_s10 = sand.u32 1, %s1061_s18   ;;  %p1395_p4 = scmp.ne.s32.totalorder %s1391_s6, 0 }
 0x227   : > { %p1396_p10 = scmp.ge.s32.totalorder %s1073_s21, 2  ;;  %s785_s11 = scalar_lea.sflag [#allocation4], %s784_s10 }
 0x229   : > { %p933_p1 = pnand %p1396_p10, %p1395_p4 }
 0x22b   : > { %1056 = dma.done.wait (!%p933_p1), %s785_s11, 512  }
 0x22c   : > { %1058 = vsyncadd (!%p933_p1), %s785_s11, 4294966784  ;;  %p18_p3 = scmp.ge.s32.totalorder %s1137_s24, 4   ;;  %s1397_s18 = smov %s1065_s19 }
 0x22d   : > { %s1398_s19 = smov %s1069_s20  ;;  %s1399_s20 = smov %s1149_s27 }
 0x22e   : > { %s1400_s21 = smov %s1137_s24  ;;  %20 = sbr.rel (!%p18_p3) target bundleno = 5 (0x5), region = 85 }
 0x235   :  { %790 = vsyncpa [#allocation3], 1 }
 0x236   :  { %792 = vsyncpa [#allocation3 + $0x1], 1 }
 0x237   :  { %793 = vsyncpa [#allocation4], 1 }
 0x238   :  { %795 = vsyncpa [#allocation4 + $0x1], 1 }

</bundles_post_ra>
